<compile_context>
chip_gen: v6e
topology: v6e:2x2x1
jax: 0.10.0
libtpu: 0.0.40
codegen_flags: <defaults>
</compile_context>

<pallas_src>
import jax
import jax.numpy as jnp
from jax.experimental import pallas as pl
from jax.experimental.pallas import tpu as pltpu

HIDDEN = 128
LANE = 128      # output lanes padded to a dense 128-wide slab (unmasked vst)
SUBLANE = 8


def _round_up(x, m):
    return (x + m - 1) // m * m


# ----------------------------------------------------------------------------- kernel
def dqn_kernel(x_ref, w1_ref, w2_ref, w3_ref, b_ref, o_ref):
    # x_ref: (tb, n_obs) bf16        | w1: (n_obs, 128)  w2: (128, 128)  w3: (128, 128) bf16
    # b_ref: (3, 128) f32 packed biases | o_ref: (tb, 128) bf16 (lane-dense)
    x = x_ref[...]
    b1 = b_ref[0:1, :]
    b2 = b_ref[1:2, :]
    b3 = b_ref[2:3, :]

    # Layer 1: narrow-K matmul (K = n_obs); Mosaic zero-pads the MXU operand.
    h1 = jnp.dot(x, w1_ref[...], preferred_element_type=jnp.float32) + b1
    h1 = jnp.maximum(h1, 0.0).astype(w2_ref.dtype)       # ReLU, back to bf16 for MXU

    h2 = jnp.dot(h1, w2_ref[...], preferred_element_type=jnp.float32) + b2
    h2 = jnp.maximum(h2, 0.0).astype(w3_ref.dtype)        # ReLU

    out = jnp.dot(h2, w3_ref[...], preferred_element_type=jnp.float32) + b3
    o_ref[...] = out.astype(o_ref.dtype)


# ----------------------------------------------------------------------------- params
def init_dqn_params(key, n_observations, n_actions, hidden=HIDDEN):
    """PyTorch nn.Linear default init (U[-1/sqrt(fan_in), 1/sqrt(fan_in)]).
    Weights stored transposed vs. torch ([in, out]) so the kernel computes x @ W + b."""
    def linear(k, fan_in, fan_out):
        kw, kb = jax.random.split(k)
        bound = 1.0 / jnp.sqrt(fan_in)
        w = jax.random.uniform(kw, (fan_in, fan_out), jnp.float32, -bound, bound)
        b = jax.random.uniform(kb, (fan_out,), jnp.float32, -bound, bound)
        return w, b

    k1, k2, k3 = jax.random.split(key, 3)
    w1, b1 = linear(k1, n_observations, hidden)
    w2, b2 = linear(k2, hidden, hidden)
    w3, b3 = linear(k3, hidden, n_actions)
    return (w1, b1, w2, b2, w3, b3)


def prepare_dqn_params(params, compute_dtype=jnp.bfloat16):
    """One-time cast/pad/pack of params for the kernel (do once, reuse per call)."""
    w1, b1, w2, b2, w3, b3 = params
    n_obs = w1.shape[0]
    n_act = w3.shape[1]
    assert w1.shape[1] == HIDDEN and w2.shape == (HIDDEN, HIDDEN) and w3.shape[0] == HIDDEN
    assert n_act <= LANE, "kernel assumes n_actions <= 128"
    del n_obs  # w1 is kept at its native (n_obs, 128) shape — no K padding needed.

    w1p = w1.astype(compute_dtype)
    w2p = w2.astype(compute_dtype)
    w3p = jnp.zeros((HIDDEN, LANE), compute_dtype).at[:, :n_act].set(w3.astype(compute_dtype))

    b3p = jnp.zeros((LANE,), jnp.float32).at[:n_act].set(b3.astype(jnp.float32))
    bp = jnp.stack([b1.astype(jnp.float32), b2.astype(jnp.float32), b3p], axis=0)  # (3, 128)
    return (w1p, w2p, w3p, bp)


# ----------------------------------------------------------------------------- tiling
def _choose_batch_tiling(batch, tb_max):
    """Pick the number of tiles first so padding waste is bounded (< 8 rows/tile),
    then size the tile. Force >=2 balanced grid steps for replay-sized batches so the
    'parallel' grid axis gives v7x's second TensorCore real work."""
    n_tiles = pl.cdiv(batch, tb_max)
    if batch >= 256:
        n_tiles = max(n_tiles, 2)
    tb = _round_up(pl.cdiv(batch, n_tiles), SUBLANE)
    return tb, n_tiles, n_tiles * tb


# ----------------------------------------------------------------------------- wrapper
def dqn_forward(x, packed_params, n_actions, *, tb_max=2048, compute_dtype=jnp.bfloat16):
    w1p, w2p, w3p, bp = packed_params
    B, n_obs = x.shape
    assert w1p.shape[0] == n_obs
    n_pad = w3p.shape[1]

    tb, n_tiles, b_pad = _choose_batch_tiling(B, tb_max)

    # Only the batch dim is padded (a handful of rows); observations keep their native
    # width, so no lane-inflated HBM copy of x is ever materialized.
    # NOTE: bf16 observations are fine for CartPole-scale inputs; keep layer-1 input
    # in f32 if an environment needs more mantissa.
    xb = x.astype(compute_dtype)
    if b_pad != B:
        xb = jnp.pad(xb, ((0, b_pad - B), (0, 0)))

    # Advisory cost so XLA schedules the custom call sensibly inside the training step.
    itemsize = jnp.dtype(compute_dtype).itemsize
    flops = 2 * b_pad * (n_obs * HIDDEN + HIDDEN * HIDDEN + HIDDEN * n_pad)
    bytes_accessed = (xb.size * itemsize
                      + (w1p.size + w2p.size + w3p.size) * itemsize
                      + bp.size * 4
                      + b_pad * n_pad * itemsize)
    cost = pl.CostEstimate(flops=flops, transcendentals=0, bytes_accessed=bytes_accessed)

    # Scoped-VMEM only needs an explicit bump for very large tiles (v5e 16 MiB default).
    tile_bytes = tb * n_obs * itemsize + tb * n_pad * itemsize
    weight_bytes = (w1p.size + w2p.size + w3p.size) * itemsize + bp.size * 4
    vmem_need = 2 * tile_bytes + 2 * weight_bytes + (2 << 20)
    vmem_limit = int(min(vmem_need, 64 << 20)) if vmem_need > (12 << 20) else None

    def call(single_buffer_weights):
        def wspec(shape):
            # Grid-invariant operands: constant index_map keeps them resident; request a
            # single pipeline buffer to skip the redundant second copy when supported.
            if single_buffer_weights:
                return pl.BlockSpec(shape, lambda i: (0, 0), pipeline_mode=pl.Buffered(1))
            return pl.BlockSpec(shape, lambda i: (0, 0))

        return pl.pallas_call(
            dqn_kernel,
            out_shape=jax.ShapeDtypeStruct((b_pad, n_pad), compute_dtype),
            grid_spec=pltpu.PrefetchScalarGridSpec(
                num_scalar_prefetch=0,
                grid=(n_tiles,),
                in_specs=[
                    pl.BlockSpec((tb, n_obs), lambda i: (i, 0)),   # activations stream
                    wspec((n_obs, HIDDEN)),                        # weights stay resident
                    wspec((HIDDEN, HIDDEN)),
                    wspec((HIDDEN, n_pad)),
                    wspec((3, n_pad)),                             # packed biases
                ],
                out_specs=pl.BlockSpec((tb, n_pad), lambda i: (i, 0)),  # lane-dense output
            ),
            compiler_params=pltpu.CompilerParams(
                dimension_semantics=("parallel",),                 # megacore split on v7x
                vmem_limit_bytes=vmem_limit,
            ),
            cost_estimate=cost,
        )(xb, w1p, w2p, w3p, bp)

    try:
        out = call(single_buffer_weights=True)
    except Exception:
        # pl.Buffered(1) not supported on this jax build -> default double-buffering.
        out = call(single_buffer_weights=False)

    # Slice off batch/lane padding and restore the module's f32 interface dtype.
    return out[:B, :n_actions].astype(jnp.float32)


# ----------------------------------------------------------------------------- reference
def dqn_reference(x, params, compute_dtype=jnp.bfloat16):
    """Pure-JAX reference with the same bf16-operand / f32-accumulate numerics."""
    w1, b1, w2, b2, w3, b3 = params
    xd = x.astype(compute_dtype)
    h1 = jnp.maximum(
        jnp.dot(xd, w1.astype(compute_dtype), preferred_element_type=jnp.float32) + b1, 0.0)
    h2 = jnp.maximum(
        jnp.dot(h1.astype(compute_dtype), w2.astype(compute_dtype),
                preferred_element_type=jnp.float32) + b2, 0.0)
    return jnp.dot(h2.astype(compute_dtype), w3.astype(compute_dtype),
                   preferred_element_type=jnp.float32) + b3


if __name__ == "__main__":
    key = jax.random.PRNGKey(0)
    k_params, k_x1, k_x2 = jax.random.split(key, 3)

    n_observations = 4   # CartPole-style observation dim
    n_actions = 2        # CartPole-style action dim

    params = init_dqn_params(k_params, n_observations, n_actions)
    packed = prepare_dqn_params(params)

    # Small per-step inference batch (grid=(1,), tb=8).
    x_small = jax.random.normal(k_x1, (8, n_observations), jnp.float32)
    out_small = jax.block_until_ready(dqn_forward(x_small, packed, n_actions))
    ref_small = dqn_reference(x_small, params)
    assert out_small.shape == (8, n_actions)
    assert jnp.allclose(out_small, ref_small, atol=2e-2, rtol=2e-2), "small-batch mismatch"

    # Replay-buffer-style batch: exercises balanced tiling (grid=(2,), tb=304 for B=600).
    x_big = jax.random.normal(k_x2, (600, n_observations), jnp.float32)
    out_big = jax.block_until_ready(dqn_forward(x_big, packed, n_actions))
    ref_big = dqn_reference(x_big, params)
    assert out_big.shape == (600, n_actions)
    assert jnp.allclose(out_big, ref_big, atol=2e-2, rtol=2e-2), "big-batch mismatch"

    print("KERNEL_OK")
</pallas_src>

<mosaic_0001>
module attributes {stable_mosaic.version = 11 : i64} {
  func.func @dqn_kernel(%arg0: i32, %arg1: memref<8x4xbf16, #tpu.memory_space<vmem>>, %arg2: memref<4x128xbf16, #tpu.memory_space<vmem>>, %arg3: memref<128x128xbf16, #tpu.memory_space<vmem>>, %arg4: memref<128x128xbf16, #tpu.memory_space<vmem>>, %arg5: memref<3x128xf32, #tpu.memory_space<vmem>>, %arg6: memref<8x128xbf16, #tpu.memory_space<vmem>>) attributes {dimension_semantics = [#tpu.dimension_semantics<parallel>], iteration_bounds = array<i64: 1>, scalar_prefetch = 0 : i64, scratch_operands = 0 : i64, tpu.core_type = #tpu.core_type<tc>, window_params = [{transform_indices = @transform_0, window_bounds = array<i64: 8, 4>}, {pipeline_mode = #tpu.pipeline_mode<synchronous>, transform_indices = @transform_1, window_bounds = array<i64: 4, 128>}, {pipeline_mode = #tpu.pipeline_mode<synchronous>, transform_indices = @transform_2, window_bounds = array<i64: 128, 128>}, {pipeline_mode = #tpu.pipeline_mode<synchronous>, transform_indices = @transform_3, window_bounds = array<i64: 128, 128>}, {pipeline_mode = #tpu.pipeline_mode<synchronous>, transform_indices = @transform_4, window_bounds = array<i64: 3, 128>}, {transform_indices = @transform_5, window_bounds = array<i64: 8, 128>}]} {
    %c0 = arith.constant 0 : index
    %c0_0 = arith.constant 0 : index
    %0 = vector.load %arg1[%c0, %c0_0] : memref<8x4xbf16, #tpu.memory_space<vmem>>, vector<8x4xbf16>
    %c0_1 = arith.constant 0 : index
    %c0_2 = arith.constant 0 : index
    %1 = vector.load %arg5[%c0_1, %c0_2] : memref<3x128xf32, #tpu.memory_space<vmem>>, vector<1x128xf32>
    %c1 = arith.constant 1 : index
    %c0_3 = arith.constant 0 : index
    %2 = vector.load %arg5[%c1, %c0_3] : memref<3x128xf32, #tpu.memory_space<vmem>>, vector<1x128xf32>
    %c2 = arith.constant 2 : index
    %c0_4 = arith.constant 0 : index
    %3 = vector.load %arg5[%c2, %c0_4] : memref<3x128xf32, #tpu.memory_space<vmem>>, vector<1x128xf32>
    %c0_5 = arith.constant 0 : index
    %c0_6 = arith.constant 0 : index
    %4 = vector.load %arg2[%c0_5, %c0_6] : memref<4x128xbf16, #tpu.memory_space<vmem>>, vector<4x128xbf16>
    %cst = arith.constant dense<0.000000e+00> : vector<8x128xf32>
    %5 = tpu.matmul %0, %4, %cst {dimension_numbers = #tpu.dot_dimension_numbers<[1], [0], [0], [1], [0, 0, 1, 1], [], []>} : vector<8x4xbf16>, vector<4x128xbf16>, vector<8x128xf32> -> vector<8x128xf32>
    %6 = vector.broadcast %1 : vector<1x128xf32> to vector<8x128xf32>
    %7 = arith.addf %5, %6 : vector<8x128xf32>
    %cst_7 = arith.constant 0.000000e+00 : f32
    %8 = vector.broadcast %cst_7 : f32 to vector<8x128xf32>
    %9 = arith.maximumf %7, %8 : vector<8x128xf32>
    %10 = arith.truncf %9 : vector<8x128xf32> to vector<8x128xbf16>
    %c0_8 = arith.constant 0 : index
    %c0_9 = arith.constant 0 : index
    %11 = vector.load %arg3[%c0_8, %c0_9] : memref<128x128xbf16, #tpu.memory_space<vmem>>, vector<128x128xbf16>
    %cst_10 = arith.constant dense<0.000000e+00> : vector<8x128xf32>
    %12 = tpu.matmul %10, %11, %cst_10 {dimension_numbers = #tpu.dot_dimension_numbers<[1], [0], [0], [1], [0, 0, 1, 1], [], []>} : vector<8x128xbf16>, vector<128x128xbf16>, vector<8x128xf32> -> vector<8x128xf32>
    %13 = vector.broadcast %2 : vector<1x128xf32> to vector<8x128xf32>
    %14 = arith.addf %12, %13 : vector<8x128xf32>
    %cst_11 = arith.constant 0.000000e+00 : f32
    %15 = vector.broadcast %cst_11 : f32 to vector<8x128xf32>
    %16 = arith.maximumf %14, %15 : vector<8x128xf32>
    %17 = arith.truncf %16 : vector<8x128xf32> to vector<8x128xbf16>
    %c0_12 = arith.constant 0 : index
    %c0_13 = arith.constant 0 : index
    %18 = vector.load %arg4[%c0_12, %c0_13] : memref<128x128xbf16, #tpu.memory_space<vmem>>, vector<128x128xbf16>
    %cst_14 = arith.constant dense<0.000000e+00> : vector<8x128xf32>
    %19 = tpu.matmul %17, %18, %cst_14 {dimension_numbers = #tpu.dot_dimension_numbers<[1], [0], [0], [1], [0, 0, 1, 1], [], []>} : vector<8x128xbf16>, vector<128x128xbf16>, vector<8x128xf32> -> vector<8x128xf32>
    %20 = vector.broadcast %3 : vector<1x128xf32> to vector<8x128xf32>
    %21 = arith.addf %19, %20 : vector<8x128xf32>
    %22 = arith.truncf %21 : vector<8x128xf32> to vector<8x128xbf16>
    %c0_15 = arith.constant 0 : index
    %c0_16 = arith.constant 0 : index
    %23 = vector.load %arg6[%c0_15, %c0_16] : memref<8x128xbf16, #tpu.memory_space<vmem>>, vector<8x128xbf16>
    tpu.vector_store %arg6[%c0_15, %c0_16], %22 {strides = array<i32>} : memref<8x128xbf16, #tpu.memory_space<vmem>>, vector<8x128xbf16>,
    return
  }
  func.func @transform_0(%arg0: i32) -> (i32, i32) {
    %c0_i32 = arith.constant 0 : i32
    %c0_i32_0 = arith.constant 0 : i32
    return %arg0, %c0_i32 : i32, i32
  }
  func.func @transform_1(%arg0: i32) -> (i32, i32) {
    %c0_i32 = arith.constant 0 : i32
    %c0_i32_0 = arith.constant 0 : i32
    %c0_i32_1 = arith.constant 0 : i32
    return %c0_i32, %c0_i32_0 : i32, i32
  }
  func.func @transform_2(%arg0: i32) -> (i32, i32) {
    %c0_i32 = arith.constant 0 : i32
    %c0_i32_0 = arith.constant 0 : i32
    %c0_i32_1 = arith.constant 0 : i32
    return %c0_i32, %c0_i32_0 : i32, i32
  }
  func.func @transform_3(%arg0: i32) -> (i32, i32) {
    %c0_i32 = arith.constant 0 : i32
    %c0_i32_0 = arith.constant 0 : i32
    %c0_i32_1 = arith.constant 0 : i32
    return %c0_i32, %c0_i32_0 : i32, i32
  }
  func.func @transform_4(%arg0: i32) -> (i32, i32) {
    %c0_i32 = arith.constant 0 : i32
    %c0_i32_0 = arith.constant 0 : i32
    %c0_i32_1 = arith.constant 0 : i32
    return %c0_i32, %c0_i32_0 : i32, i32
  }
  func.func @transform_5(%arg0: i32) -> (i32, i32) {
    %c0_i32 = arith.constant 0 : i32
    %c0_i32_0 = arith.constant 0 : i32
    return %arg0, %c0_i32 : i32, i32
  }
}

module attributes {stable_mosaic.version = 11 : i64} {
  func.func @dqn_kernel(%arg0: i32, %arg1: memref<8x4xbf16, #tpu.memory_space<vmem>>, %arg2: memref<4x128xbf16, #tpu.memory_space<vmem>>, %arg3: memref<128x128xbf16, #tpu.memory_space<vmem>>, %arg4: memref<128x128xbf16, #tpu.memory_space<vmem>>, %arg5: memref<3x128xf32, #tpu.memory_space<vmem>>, %arg6: memref<8x128xbf16, #tpu.memory_space<vmem>>) attributes {dimension_semantics = [#tpu.dimension_semantics<parallel>], iteration_bounds = array<i64: 1>, scalar_prefetch = 0 : i64, scratch_operands = 0 : i64, tpu.core_type = #tpu.core_type<tc>, window_params = [{transform_indices = @transform_0, window_bounds = array<i64: 8, 4>}, {pipeline_mode = #tpu.pipeline_mode<synchronous>, transform_indices = @transform_1, window_bounds = array<i64: 4, 128>}, {pipeline_mode = #tpu.pipeline_mode<synchronous>, transform_indices = @transform_2, window_bounds = array<i64: 128, 128>}, {pipeline_mode = #tpu.pipeline_mode<synchronous>, transform_indices = @transform_3, window_bounds = array<i64: 128, 128>}, {pipeline_mode = #tpu.pipeline_mode<synchronous>, transform_indices = @transform_4, window_bounds = array<i64: 3, 128>}, {transform_indices = @transform_5, window_bounds = array<i64: 8, 128>}]} {
    %c0 = arith.constant 0 : index
    %c0_0 = arith.constant 0 : index
    %0 = vector.load %arg1[%c0, %c0_0] : memref<8x4xbf16, #tpu.memory_space<vmem>>, vector<8x4xbf16>
    %c0_1 = arith.constant 0 : index
    %c0_2 = arith.constant 0 : index
    %1 = vector.load %arg5[%c0_1, %c0_2] : memref<3x128xf32, #tpu.memory_space<vmem>>, vector<1x128xf32>
    %c1 = arith.constant 1 : index
    %c0_3 = arith.constant 0 : index
    %2 = vector.load %arg5[%c1, %c0_3] : memref<3x128xf32, #tpu.memory_space<vmem>>, vector<1x128xf32>
    %c2 = arith.constant 2 : index
    %c0_4 = arith.constant 0 : index
    %3 = vector.load %arg5[%c2, %c0_4] : memref<3x128xf32, #tpu.memory_space<vmem>>, vector<1x128xf32>
    %c0_5 = arith.constant 0 : index
    %c0_6 = arith.constant 0 : index
    %4 = vector.load %arg2[%c0_5, %c0_6] : memref<4x128xbf16, #tpu.memory_space<vmem>>, vector<4x128xbf16>
    %cst = arith.constant dense<0.000000e+00> : vector<8x128xf32>
    %5 = tpu.matmul %0, %4, %cst {dimension_numbers = #tpu.dot_dimension_numbers<[1], [0], [0], [1], [0, 0, 1, 1], [], []>} : vector<8x4xbf16>, vector<4x128xbf16>, vector<8x128xf32> -> vector<8x128xf32>
    %6 = vector.broadcast %1 : vector<1x128xf32> to vector<8x128xf32>
    %7 = arith.addf %5, %6 : vector<8x128xf32>
    %cst_7 = arith.constant 0.000000e+00 : f32
    %8 = vector.broadcast %cst_7 : f32 to vector<8x128xf32>
    %9 = arith.maximumf %7, %8 : vector<8x128xf32>
    %10 = arith.truncf %9 : vector<8x128xf32> to vector<8x128xbf16>
    %c0_8 = arith.constant 0 : index
    %c0_9 = arith.constant 0 : index
    %11 = vector.load %arg3[%c0_8, %c0_9] : memref<128x128xbf16, #tpu.memory_space<vmem>>, vector<128x128xbf16>
    %cst_10 = arith.constant dense<0.000000e+00> : vector<8x128xf32>
    %12 = tpu.matmul %10, %11, %cst_10 {dimension_numbers = #tpu.dot_dimension_numbers<[1], [0], [0], [1], [0, 0, 1, 1], [], []>} : vector<8x128xbf16>, vector<128x128xbf16>, vector<8x128xf32> -> vector<8x128xf32>
    %13 = vector.broadcast %2 : vector<1x128xf32> to vector<8x128xf32>
    %14 = arith.addf %12, %13 : vector<8x128xf32>
    %cst_11 = arith.constant 0.000000e+00 : f32
    %15 = vector.broadcast %cst_11 : f32 to vector<8x128xf32>
    %16 = arith.maximumf %14, %15 : vector<8x128xf32>
    %17 = arith.truncf %16 : vector<8x128xf32> to vector<8x128xbf16>
    %c0_12 = arith.constant 0 : index
    %c0_13 = arith.constant 0 : index
    %18 = vector.load %arg4[%c0_12, %c0_13] : memref<128x128xbf16, #tpu.memory_space<vmem>>, vector<128x128xbf16>
    %cst_14 = arith.constant dense<0.000000e+00> : vector<8x128xf32>
    %19 = tpu.matmul %17, %18, %cst_14 {dimension_numbers = #tpu.dot_dimension_numbers<[1], [0], [0], [1], [0, 0, 1, 1], [], []>} : vector<8x128xbf16>, vector<128x128xbf16>, vector<8x128xf32> -> vector<8x128xf32>
    %20 = vector.broadcast %3 : vector<1x128xf32> to vector<8x128xf32>
    %21 = arith.addf %19, %20 : vector<8x128xf32>
    %22 = arith.truncf %21 : vector<8x128xf32> to vector<8x128xbf16>
    %c0_15 = arith.constant 0 : index
    %c0_16 = arith.constant 0 : index
    %23 = vector.load %arg6[%c0_15, %c0_16] : memref<8x128xbf16, #tpu.memory_space<vmem>>, vector<8x128xbf16>
    tpu.vector_store %arg6[%c0_15, %c0_16], %22 {strides = array<i32>} : memref<8x128xbf16, #tpu.memory_space<vmem>>, vector<8x128xbf16>,
    return
  }
  func.func @transform_0(%arg0: i32) -> (i32, i32) {
    %c0_i32 = arith.constant 0 : i32
    %c0_i32_0 = arith.constant 0 : i32
    return %arg0, %c0_i32 : i32, i32
  }
  func.func @transform_1(%arg0: i32) -> (i32, i32) {
    %c0_i32 = arith.constant 0 : i32
    %c0_i32_0 = arith.constant 0 : i32
    %c0_i32_1 = arith.constant 0 : i32
    return %c0_i32, %c0_i32_0 : i32, i32
  }
  func.func @transform_2(%arg0: i32) -> (i32, i32) {
    %c0_i32 = arith.constant 0 : i32
    %c0_i32_0 = arith.constant 0 : i32
    %c0_i32_1 = arith.constant 0 : i32
    return %c0_i32, %c0_i32_0 : i32, i32
  }
  func.func @transform_3(%arg0: i32) -> (i32, i32) {
    %c0_i32 = arith.constant 0 : i32
    %c0_i32_0 = arith.constant 0 : i32
    %c0_i32_1 = arith.constant 0 : i32
    return %c0_i32, %c0_i32_0 : i32, i32
  }
  func.func @transform_4(%arg0: i32) -> (i32, i32) {
    %c0_i32 = arith.constant 0 : i32
    %c0_i32_0 = arith.constant 0 : i32
    %c0_i32_1 = arith.constant 0 : i32
    return %c0_i32, %c0_i32_0 : i32, i32
  }
  func.func @transform_5(%arg0: i32) -> (i32, i32) {
    %c0_i32 = arith.constant 0 : i32
    %c0_i32_0 = arith.constant 0 : i32
    return %arg0, %c0_i32 : i32, i32
  }
}

</mosaic_0001>

<bundles_post_ra>
// kernel: tpu_custom_call.1
= control target key start
LH: loop header
LB: loop body
LE: loop exit
PB: predicated region body
PF: predicated region fallthrough
CT: control target
= control target key end

     0   :  { %10 = vsyncpa [#allocation3], 0  ;;  %s604_s0 = inlined_call_operand.vmem [shape: bf16[8,4], index: 0, kind: input, shape index: {}]   ;;  %s605_s1 = inlined_call_operand.vmem [shape: bf16[4,128], index: 1, kind: input, shape index: {}]   ;;  %s606_s2 = inlined_call_operand.hbm [shape: bf16[128,128], index: 2, kind: input, shape index: {}]   ;;  %s607_s3 = inlined_call_operand.hbm [shape: bf16[128,128], index: 3, kind: input, shape index: {}]   ;;  %s608_s4 = inlined_call_operand.vmem [shape: f32[3,128], index: 4, kind: input, shape index: {}]   ;;  %s609_s5 = inlined_call_operand.hbm [shape: bf16[8,128], index: 5, kind: output, shape index: {}]  }
   0x1   :  { %11 = vsyncpa [#allocation6], 0 }
   0x2   :  { %12 = vsyncpa [#allocation4], 0  ;;  %s520_s18 = smov [#allocation2]  }
   0x3   :  { %s22_s19 = sshll.u32 %s520_s18, 4  ;;  %s23_s19 = int_to_ptr.vmem [resolvable:$true] %s22_s19 }
   0x4   :  { %s462_s20 = scalar_lea.vmem %s23_s19, 1024  ;;  %p467_p1 = scmp.lt.s32.totalorder %s23_s19, %s23_s19 }
   0x5   :  { %p463_p0 = scmp.ne.s32.totalorder %s23_s19, %s462_s20  ;;  %p468_p2 = scmp.lt.s32.totalorder %s462_s20, %s462_s20 }
   0x7   :  { %p469_p3 = por %p468_p2, %p467_p1 }
   0x9   :  { %p470_p4 = pnand %p469_p3, %p463_p0 }
   0xb   :  { %473 = shalt.err (!%p470_p4)
}
   0xc   :  { %s521_s21 = smov 64   ;;  %s522_s22 = smov 4  }
   0xd   :  { %28 = dma.hbm_to_vmem [thread:$0]  %s606_s2, 1024, %s23_s19, [#allocation3], %s521_s21, %s521_s21, %s522_s22  }
   0xe   :  { %s523_s25 = smov [#allocation5]  }
   0xf   :  { %s34_s26 = sshll.u32 %s523_s25, 4  ;;  %s35_s26 = int_to_ptr.vmem [resolvable:$true] %s34_s26 }
  0x10   :  { %s482_s27 = scalar_lea.vmem %s35_s26, 1024  ;;  %p487_p6 = scmp.lt.s32.totalorder %s35_s26, %s35_s26 }
  0x11   :  { %p483_p5 = scmp.ne.s32.totalorder %s35_s26, %s482_s27  ;;  %p488_p7 = scmp.lt.s32.totalorder %s482_s27, %s482_s27 }
  0x13   :  { %p489_p8 = por %p488_p7, %p487_p6 }
  0x15   :  { %p490_p9 = pnand %p489_p8, %p483_p5 }
  0x17   :  { %493 = shalt.err (!%p490_p9)
}
  0x18   :  { %40 = dma.hbm_to_vmem [thread:$0]  %s607_s3, 1024, %s35_s26, [#allocation6], %s521_s21, %s521_s21, %s522_s22  }
  0x19   :  { %514 = dma.done.wait [#allocation3], 1024  }
  0x1a   :  { %515 = vsyncadd [#allocation3], 4294966272 }
  0x1b   :  { %516 = dma.done.wait [#allocation6], 1024  }
  0x1c   :  { %517 = vsyncadd [#allocation6], 4294966272  ;;  %v524_v0 = vmov 0.0   ;;  %vm525_vm0 = vmmov 0   ;;  %vm63_vm1 = vcmask 1041408   ;;  %vm59_vm2 = vcmask 31744  }
  0x1d   :  { %385 = vmatprep.subr.bf16.mxu0 %v524_v0  ;;  %387 = vmatprep.mubr.msk.bf16.mxu0 %vm525_vm0, %v524_v0  ;;  %v54_v1 = vld [vmem:[%s605_s1] sm:$0x3]  ;;  %v438_v3 = vld [vmem:[#allocation2 + $0x38] sm:$0xff]   ;;  %v439_v5 = vld [vmem:[#allocation2 + $0x30] sm:$0xff]   ;;  %s526_s11 = smov [#allocation7]  }
  0x1e   :  { %391 = vmatprep.subr.bf16.mxu1 %v524_v0  ;;  %407 = vmatprep.mubr.msk.bf16.mxu1 %vm525_vm0, %v524_v0  ;;  %v65_v2 = vsel %vm63_vm1, %v54_v1, 0  ;;  %v50_v4 = vld [vmem:[%s604_s0] sm:$0xf]  ;;  %v440_v6 = vld [vmem:[#allocation2 + $0x28] sm:$0xff]   ;;  %v442_v8 = vld [vmem:[#allocation2 + $0x18] sm:$0xff]   ;;  %s335_s12 = sshll.u32 %s526_s11, 4  ;;  %s336_s12 = int_to_ptr.vmem [resolvable:$true] %s335_s12 }
  0x1f   :  { %386 = vmatpush3.bf16.msra.mxu0 %v65_v2  ;;  %392 = vmatpush3.bf16.msra.mxu1 %v438_v3  ;;  %v441_v7 = vld [vmem:[#allocation2 + $0x20] sm:$0xff]   ;;  %v443_v9 = vld [vmem:[#allocation2 + $0x10] sm:$0xff]   ;;  %v444_v10 = vld [vmem:[#allocation2 + $0x8] sm:$0xff]   ;;  %s494_s13 = scalar_lea.vmem %s336_s12, 64  ;;  %p499_p11 = scmp.lt.s32.totalorder %s336_s12, %s336_s12 }
  0x20   :  { %411 = vmatprep.subr.bf16.mxu0 %v524_v0  ;;  %393 = vmatprep.subr.bf16.mxu1 %v524_v0  ;;  %v445_v11 = vld [vmem:[#allocation2] sm:$0xff]   ;;  %v446_v12 = vld [vmem:[#allocation5 + $0x38] sm:$0xff]   ;;  %v447_v13 = vld [vmem:[#allocation5 + $0x30] sm:$0xff]   ;;  %p495_p10 = scmp.ne.s32.totalorder %s336_s12, %s494_s13  ;;  %p500_p12 = scmp.lt.s32.totalorder %s494_s13, %s494_s13 }
  0x21   :  { %v448_v14 = vld [vmem:[#allocation5 + $0x28] sm:$0xff]   ;;  %v449_v15 = vld [vmem:[#allocation5 + $0x20] sm:$0xff]   ;;  %v450_v16 = vld [vmem:[#allocation5 + $0x18] sm:$0xff]  }
  0x22   :  { %388 = vmatmul.mubr.msk.bf16.vlgmr.msra.gmra.mxu0 %vm59_vm2, %v50_v4  ;;  %v451_v17 = vld [vmem:[#allocation5 + $0x10] sm:$0xff]   ;;  %v345_v18 = vld [vmem:[%s608_s4] ss:$0 sm:$0xff]  ;;  %v452_v26 = vld [vmem:[#allocation5 + $0x8] sm:$0xff]   ;;  %p501_p13 = por %p500_p12, %p499_p11 }
  0x23   :  { %427 = vmatprep.mubr.msk.bf16.mxu0 %vm525_vm0, %v524_v0  ;;  %394 = vmatpush3.bf16.msra.mxu1 %v439_v5  ;;  %v453_v27 = vld [vmem:[#allocation5] sm:$0xff]  }
  0x24   :  { %395 = vmatprep.subr.bf16.mxu1 %v524_v0  ;;  %412 = vmatpush3.bf16.msra.mxu0 %v446_v12  ;;  %v347_v28 = vld [vmem:[%s608_s4 + $0x1] ss:$0 sm:$0xff]  ;;  %v356_v36 = vld [vmem:[%s608_s4 + $0x2] ss:$0 sm:$0xff]  ;;  %p502_p0 = pnand %p501_p13, %p495_p10 }
  0x25   :  { %413 = vmatprep.subr.bf16.mxu0 %v524_v0 }
  0x27   :  { %396 = vmatpush3.bf16.msra.mxu1 %v440_v6 }
  0x28   :  { %397 = vmatprep.subr.bf16.mxu1 %v524_v0  ;;  %414 = vmatpush3.bf16.msra.mxu0 %v447_v13 }
  0x29   :  { %415 = vmatprep.subr.bf16.mxu0 %v524_v0 }
  0x2b   :  { %398 = vmatpush3.bf16.msra.mxu1 %v441_v7 }
  0x2c   :  { %399 = vmatprep.subr.bf16.mxu1 %v524_v0  ;;  %416 = vmatpush3.bf16.msra.mxu0 %v448_v14 }
  0x2d   :  { %417 = vmatprep.subr.bf16.mxu0 %v524_v0 }
  0x2f   :  { %400 = vmatpush3.bf16.msra.mxu1 %v442_v8 }
  0x30   :  { %401 = vmatprep.subr.bf16.mxu1 %v524_v0  ;;  %418 = vmatpush3.bf16.msra.mxu0 %v449_v15 }
  0x31   :  { %419 = vmatprep.subr.bf16.mxu0 %v524_v0 }
  0x33   :  { %402 = vmatpush3.bf16.msra.mxu1 %v443_v9 }
  0x34   :  { %403 = vmatprep.subr.bf16.mxu1 %v524_v0  ;;  %420 = vmatpush3.bf16.msra.mxu0 %v450_v16 }
  0x35   :  { %421 = vmatprep.subr.bf16.mxu0 %v524_v0 }
  0x37   :  { %404 = vmatpush3.bf16.msra.mxu1 %v444_v10 }
  0x38   :  { %405 = vmatprep.subr.bf16.mxu1 %v524_v0  ;;  %422 = vmatpush3.bf16.msra.mxu0 %v451_v17 }
  0x39   :  { %423 = vmatprep.subr.bf16.mxu0 %v524_v0 }
  0x3b   :  { %406 = vmatpush3.bf16.msra.mxu1 %v445_v11 }
  0x3c   :  { %424 = vmatpush3.bf16.msra.mxu0 %v452_v26 }
  0x3d   :  { %425 = vmatprep.subr.bf16.mxu0 %v524_v0 }
  0x40   :  { %426 = vmatpush3.bf16.msra.mxu0 %v453_v27 }
  0xe2   :  { %v101_v19 = vpop.f32.mrf.mxu0 }
  0xe3   :  { %v102_v20 = vadd.f32 %v345_v18, %v101_v19 }
  0xe4   :  { %v389_v21 = vpop.f32.mrf.mxu0 }
  0xe5   :  { %v107_v22 = vmax.f32 %v102_v20, 0.0 }
  0xe6   :  { %v104_v23 = vpop.f32.mrf.mxu0 }
  0xe7   :  { %v108_v24 = vpack.c.bf16 %v107_v22, %v107_v22 }
  0xe8   :  { %v390_v25 = vpop.f32.mrf.mxu0 }
  0xe9   :  { %408 = vmatmul.mubr.bf16.vlgmr.msra.gmra.mxu1 %v108_v24 }
 0x1a9   :  { %v211_v29 = vpop.f32.mrf.mxu1 }
 0x1aa   :  { %v212_v30 = vadd.f32 %v347_v28, %v211_v29 }
 0x1ab   :  { %v409_v31 = vpop.f32.mrf.mxu1 }
 0x1ac   :  { %v217_v32 = vmax.f32 %v212_v30, 0.0 }
 0x1ad   :  { %v214_v33 = vpop.f32.mrf.mxu1 }
 0x1ae   :  { %v218_v34 = vpack.c.bf16 %v217_v32, %v217_v32 }
 0x1af   :  { %v410_v35 = vpop.f32.mrf.mxu1 }
 0x1b0   :  { %428 = vmatmul.mubr.bf16.vlgmr.msra.gmra.mxu0 %v218_v34 }
 0x270   :  { %v321_v37 = vpop.f32.mrf.mxu0 }
 0x271   :  { %v322_v38 = vadd.f32 %v356_v36, %v321_v37 }
 0x272   :  { %v429_v39 = vpop.f32.mrf.mxu0 }
 0x273   :  { %v327_v40 = vpack.c.bf16 %v322_v38, %v322_v38 }
 0x274   :  { %v324_v41 = vpop.f32.mrf.mxu0 }
 0x275   :  { %328 = vst [vmem:[#allocation7] sm:$0xf] %v327_v40 }
 0x276   :  { %v430_v42 = vpop.f32.mrf.mxu0 }
 0x277   :  { %505 = shalt.err (!%p502_p0)
}
 0x278   :  { %338 = dma.vmem_to_hbm [thread:$0]  %s336_s12, 64, %s609_s5, [#allocation4]  }
 0x279   :  { %518 = dma.done.wait [#allocation4], 64  }
 0x27a   :  { %519 = vsyncadd [#allocation4], 4294967232 }
 0x27b   :  { %342 = vsyncpa [#allocation3], 1 }
 0x27c   :  { %343 = vsyncpa [#allocation6], 1 }
 0x27d   :  { %344 = vsyncpa [#allocation4], 1 }

// kernel: tpu_custom_call.1
= control target key start
LH: loop header
LB: loop body
LE: loop exit
PB: predicated region body
PF: predicated region fallthrough
CT: control target
= control target key end

     0   :  { %10 = vsyncpa [#allocation3], 0  ;;  %s604_s0 = inlined_call_operand.vmem [shape: bf16[8,4], index: 0, kind: input, shape index: {}]   ;;  %s605_s1 = inlined_call_operand.vmem [shape: bf16[4,128], index: 1, kind: input, shape index: {}]   ;;  %s606_s2 = inlined_call_operand.hbm [shape: bf16[128,128], index: 2, kind: input, shape index: {}]   ;;  %s607_s3 = inlined_call_operand.hbm [shape: bf16[128,128], index: 3, kind: input, shape index: {}]   ;;  %s608_s4 = inlined_call_operand.vmem [shape: f32[3,128], index: 4, kind: input, shape index: {}]   ;;  %s609_s5 = inlined_call_operand.hbm [shape: bf16[8,128], index: 5, kind: output, shape index: {}]  }
   0x1   :  { %11 = vsyncpa [#allocation6], 0 }
   0x2   :  { %12 = vsyncpa [#allocation4], 0  ;;  %s520_s18 = smov [#allocation2]  }
   0x3   :  { %s22_s19 = sshll.u32 %s520_s18, 4  ;;  %s23_s19 = int_to_ptr.vmem [resolvable:$true] %s22_s19 }
   0x4   :  { %s462_s20 = scalar_lea.vmem %s23_s19, 1024  ;;  %p467_p1 = scmp.lt.s32.totalorder %s23_s19, %s23_s19 }
   0x5   :  { %p463_p0 = scmp.ne.s32.totalorder %s23_s19, %s462_s20  ;;  %p468_p2 = scmp.lt.s32.totalorder %s462_s20, %s462_s20 }
   0x7   :  { %p469_p3 = por %p468_p2, %p467_p1 }
   0x9   :  { %p470_p4 = pnand %p469_p3, %p463_p0 }
   0xb   :  { %473 = shalt.err (!%p470_p4)
}
   0xc   :  { %s521_s21 = smov 64   ;;  %s522_s22 = smov 4  }
   0xd   :  { %28 = dma.hbm_to_vmem [thread:$0]  %s606_s2, 1024, %s23_s19, [#allocation3], %s521_s21, %s521_s21, %s522_s22  }
   0xe   :  { %s523_s25 = smov [#allocation5]  }
   0xf   :  { %s34_s26 = sshll.u32 %s523_s25, 4  ;;  %s35_s26 = int_to_ptr.vmem [resolvable:$true] %s34_s26 }
  0x10   :  { %s482_s27 = scalar_lea.vmem %s35_s26, 1024  ;;  %p487_p6 = scmp.lt.s32.totalorder %s35_s26, %s35_s26 }
  0x11   :  { %p483_p5 = scmp.ne.s32.totalorder %s35_s26, %s482_s27  ;;  %p488_p7 = scmp.lt.s32.totalorder %s482_s27, %s482_s27 }
  0x13   :  { %p489_p8 = por %p488_p7, %p487_p6 }
  0x15   :  { %p490_p9 = pnand %p489_p8, %p483_p5 }
  0x17   :  { %493 = shalt.err (!%p490_p9)
}
  0x18   :  { %40 = dma.hbm_to_vmem [thread:$0]  %s607_s3, 1024, %s35_s26, [#allocation6], %s521_s21, %s521_s21, %s522_s22  }
  0x19   :  { %514 = dma.done.wait [#allocation3], 1024  }
  0x1a   :  { %515 = vsyncadd [#allocation3], 4294966272 }
  0x1b   :  { %516 = dma.done.wait [#allocation6], 1024  }
  0x1c   :  { %517 = vsyncadd [#allocation6], 4294966272  ;;  %v524_v0 = vmov 0.0   ;;  %vm525_vm0 = vmmov 0   ;;  %vm63_vm1 = vcmask 1041408   ;;  %vm59_vm2 = vcmask 31744  }
  0x1d   :  { %385 = vmatprep.subr.bf16.mxu0 %v524_v0  ;;  %387 = vmatprep.mubr.msk.bf16.mxu0 %vm525_vm0, %v524_v0  ;;  %v54_v1 = vld [vmem:[%s605_s1] sm:$0x3]  ;;  %v438_v3 = vld [vmem:[#allocation2 + $0x38] sm:$0xff]   ;;  %v439_v5 = vld [vmem:[#allocation2 + $0x30] sm:$0xff]   ;;  %s526_s11 = smov [#allocation7]  }
  0x1e   :  { %391 = vmatprep.subr.bf16.mxu1 %v524_v0  ;;  %407 = vmatprep.mubr.msk.bf16.mxu1 %vm525_vm0, %v524_v0  ;;  %v65_v2 = vsel %vm63_vm1, %v54_v1, 0  ;;  %v50_v4 = vld [vmem:[%s604_s0] sm:$0xf]  ;;  %v440_v6 = vld [vmem:[#allocation2 + $0x28] sm:$0xff]   ;;  %v442_v8 = vld [vmem:[#allocation2 + $0x18] sm:$0xff]   ;;  %s335_s12 = sshll.u32 %s526_s11, 4  ;;  %s336_s12 = int_to_ptr.vmem [resolvable:$true] %s335_s12 }
  0x1f   :  { %386 = vmatpush3.bf16.msra.mxu0 %v65_v2  ;;  %392 = vmatpush3.bf16.msra.mxu1 %v438_v3  ;;  %v441_v7 = vld [vmem:[#allocation2 + $0x20] sm:$0xff]   ;;  %v443_v9 = vld [vmem:[#allocation2 + $0x10] sm:$0xff]   ;;  %v444_v10 = vld [vmem:[#allocation2 + $0x8] sm:$0xff]   ;;  %s494_s13 = scalar_lea.vmem %s336_s12, 64  ;;  %p499_p11 = scmp.lt.s32.totalorder %s336_s12, %s336_s12 }
  0x20   :  { %411 = vmatprep.subr.bf16.mxu0 %v524_v0  ;;  %393 = vmatprep.subr.bf16.mxu1 %v524_v0  ;;  %v445_v11 = vld [vmem:[#allocation2] sm:$0xff]   ;;  %v446_v12 = vld [vmem:[#allocation5 + $0x38] sm:$0xff]   ;;  %v447_v13 = vld [vmem:[#allocation5 + $0x30] sm:$0xff]   ;;  %p495_p10 = scmp.ne.s32.totalorder %s336_s12, %s494_s13  ;;  %p500_p12 = scmp.lt.s32.totalorder %s494_s13, %s494_s13 }
  0x21   :  { %v448_v14 = vld [vmem:[#allocation5 + $0x28] sm:$0xff]   ;;  %v449_v15 = vld [vmem:[#allocation5 + $0x20] sm:$0xff]   ;;  %v450_v16 = vld [vmem:[#allocation5 + $0x18] sm:$0xff]  }
  0x22   :  { %388 = vmatmul.mubr.msk.bf16.vlgmr.msra.gmra.mxu0 %vm59_vm2, %v50_v4  ;;  %v451_v17 = vld [vmem:[#allocation5 + $0x10] sm:$0xff]   ;;  %v345_v18 = vld [vmem:[%s608_s4] ss:$0 sm:$0xff]  ;;  %v452_v26 = vld [vmem:[#allocation5 + $0x8] sm:$0xff]   ;;  %p501_p13 = por %p500_p12, %p499_p11 }
  0x23   :  { %427 = vmatprep.mubr.msk.bf16.mxu0 %vm525_vm0, %v524_v0  ;;  %394 = vmatpush3.bf16.msra.mxu1 %v439_v5  ;;  %v453_v27 = vld [vmem:[#allocation5] sm:$0xff]  }
  0x24   :  { %395 = vmatprep.subr.bf16.mxu1 %v524_v0  ;;  %412 = vmatpush3.bf16.msra.mxu0 %v446_v12  ;;  %v347_v28 = vld [vmem:[%s608_s4 + $0x1] ss:$0 sm:$0xff]  ;;  %v356_v36 = vld [vmem:[%s608_s4 + $0x2] ss:$0 sm:$0xff]  ;;  %p502_p0 = pnand %p501_p13, %p495_p10 }
  0x25   :  { %413 = vmatprep.subr.bf16.mxu0 %v524_v0 }
  0x27   :  { %396 = vmatpush3.bf16.msra.mxu1 %v440_v6 }
  0x28   :  { %397 = vmatprep.subr.bf16.mxu1 %v524_v0  ;;  %414 = vmatpush3.bf16.msra.mxu0 %v447_v13 }
  0x29   :  { %415 = vmatprep.subr.bf16.mxu0 %v524_v0 }
  0x2b   :  { %398 = vmatpush3.bf16.msra.mxu1 %v441_v7 }
  0x2c   :  { %399 = vmatprep.subr.bf16.mxu1 %v524_v0  ;;  %416 = vmatpush3.bf16.msra.mxu0 %v448_v14 }
  0x2d   :  { %417 = vmatprep.subr.bf16.mxu0 %v524_v0 }
  0x2f   :  { %400 = vmatpush3.bf16.msra.mxu1 %v442_v8 }
  0x30   :  { %401 = vmatprep.subr.bf16.mxu1 %v524_v0  ;;  %418 = vmatpush3.bf16.msra.mxu0 %v449_v15 }
  0x31   :  { %419 = vmatprep.subr.bf16.mxu0 %v524_v0 }
  0x33   :  { %402 = vmatpush3.bf16.msra.mxu1 %v443_v9 }
  0x34   :  { %403 = vmatprep.subr.bf16.mxu1 %v524_v0  ;;  %420 = vmatpush3.bf16.msra.mxu0 %v450_v16 }
  0x35   :  { %421 = vmatprep.subr.bf16.mxu0 %v524_v0 }
  0x37   :  { %404 = vmatpush3.bf16.msra.mxu1 %v444_v10 }
  0x38   :  { %405 = vmatprep.subr.bf16.mxu1 %v524_v0  ;;  %422 = vmatpush3.bf16.msra.mxu0 %v451_v17 }
  0x39   :  { %423 = vmatprep.subr.bf16.mxu0 %v524_v0 }
  0x3b   :  { %406 = vmatpush3.bf16.msra.mxu1 %v445_v11 }
  0x3c   :  { %424 = vmatpush3.bf16.msra.mxu0 %v452_v26 }
  0x3d   :  { %425 = vmatprep.subr.bf16.mxu0 %v524_v0 }
  0x40   :  { %426 = vmatpush3.bf16.msra.mxu0 %v453_v27 }
  0xe2   :  { %v101_v19 = vpop.f32.mrf.mxu0 }
  0xe3   :  { %v102_v20 = vadd.f32 %v345_v18, %v101_v19 }
  0xe4   :  { %v389_v21 = vpop.f32.mrf.mxu0 }
  0xe5   :  { %v107_v22 = vmax.f32 %v102_v20, 0.0 }
  0xe6   :  { %v104_v23 = vpop.f32.mrf.mxu0 }
  0xe7   :  { %v108_v24 = vpack.c.bf16 %v107_v22, %v107_v22 }
  0xe8   :  { %v390_v25 = vpop.f32.mrf.mxu0 }
  0xe9   :  { %408 = vmatmul.mubr.bf16.vlgmr.msra.gmra.mxu1 %v108_v24 }
 0x1a9   :  { %v211_v29 = vpop.f32.mrf.mxu1 }
 0x1aa   :  { %v212_v30 = vadd.f32 %v347_v28, %v211_v29 }
 0x1ab   :  { %v409_v31 = vpop.f32.mrf.mxu1 }
 0x1ac   :  { %v217_v32 = vmax.f32 %v212_v30, 0.0 }
 0x1ad   :  { %v214_v33 = vpop.f32.mrf.mxu1 }
 0x1ae   :  { %v218_v34 = vpack.c.bf16 %v217_v32, %v217_v32 }
 0x1af   :  { %v410_v35 = vpop.f32.mrf.mxu1 }
 0x1b0   :  { %428 = vmatmul.mubr.bf16.vlgmr.msra.gmra.mxu0 %v218_v34 }
 0x270   :  { %v321_v37 = vpop.f32.mrf.mxu0 }
 0x271   :  { %v322_v38 = vadd.f32 %v356_v36, %v321_v37 }
 0x272   :  { %v429_v39 = vpop.f32.mrf.mxu0 }
 0x273   :  { %v327_v40 = vpack.c.bf16 %v322_v38, %v322_v38 }
 0x274   :  { %v324_v41 = vpop.f32.mrf.mxu0 }
 0x275   :  { %328 = vst [vmem:[#allocation7] sm:$0xf] %v327_v40 }
 0x276   :  { %v430_v42 = vpop.f32.mrf.mxu0 }
 0x277   :  { %505 = shalt.err (!%p502_p0)
}
 0x278   :  { %338 = dma.vmem_to_hbm [thread:$0]  %s336_s12, 64, %s609_s5, [#allocation4]  }
 0x279   :  { %518 = dma.done.wait [#allocation4], 64  }
 0x27a   :  { %519 = vsyncadd [#allocation4], 4294967232 }
 0x27b   :  { %342 = vsyncpa [#allocation3], 1 }
 0x27c   :  { %343 = vsyncpa [#allocation6], 1 }
 0x27d   :  { %344 = vsyncpa [#allocation4], 1 }

</bundles_post_ra>
